<compile_context>
chip_gen: v5e
topology: v5e:2x2
jax: 0.10.0
libtpu: 0.0.40
codegen_flags: <defaults>
</compile_context>

<pallas_src>
import functools
import math

import jax
import jax.numpy as jnp
from jax.experimental import pallas as pl
from jax.experimental.pallas import tpu as pltpu


def _round_up(n: int, m: int) -> int:
    return ((n + m - 1) // m) * m


# ---------------------------------------------------------------------------
# Kernel
# ---------------------------------------------------------------------------
def _swiglu_kernel(x_ref, w1_ref, b1_ref, w3_ref, b3_ref, w2_ref, b2_ref,
                   o_ref, acc_ref, *, h_tile: int):
    """One (row-tile, out-tile, hidden-tile) step of
    y = (silu(x@W1+b1) * (x@W3+b3)) @ W2 + b2, accumulating over the hidden
    (reduction) grid axis into an f32 VMEM scratch."""
    j = pl.program_id(2)  # hidden-reduction tile index

    @pl.when(j == 0)
    def _init():
        acc_ref[...] = jnp.zeros_like(acc_ref)

    # b1/b3 are fully resident; slice the current hidden tile (no per-step DMA).
    hstart = pl.multiple_of(j * h_tile, h_tile)
    b1 = b1_ref[:, pl.ds(hstart, h_tile)].astype(jnp.float32)
    b3 = b3_ref[:, pl.ds(hstart, h_tile)].astype(jnp.float32)

    x = x_ref[...]
    if x.dtype != w1_ref.dtype:            # trace-time: keep MXU operands same dtype
        x = x.astype(w1_ref.dtype)

    # MXU matmuls with f32 accumulation; SiLU / gating math in f32.
    a = jnp.dot(x, w1_ref[...], preferred_element_type=jnp.float32) + b1
    g = jnp.dot(x, w3_ref[...], preferred_element_type=jnp.float32) + b3
    h = (a * jax.nn.sigmoid(a)) * g
    acc_ref[...] += jnp.dot(h.astype(w2_ref.dtype), w2_ref[...],
                            preferred_element_type=jnp.float32)

    @pl.when(j == pl.num_programs(2) - 1)
    def _finalize():
        o_ref[...] = (acc_ref[...] + b2_ref[...].astype(jnp.float32)).astype(o_ref.dtype)


# ---------------------------------------------------------------------------
# Tile / VMEM policy
# ---------------------------------------------------------------------------
def _vmem_estimate(bt, d_pad, h_tile, h_pad, o_tile, x_bytes, w_bytes):
    e = 2 * bt * d_pad * x_bytes                    # x block (double-buffered)
    e += 2 * 2 * d_pad * h_tile * w_bytes           # W1 + W3 hidden tiles
    e += 2 * h_tile * o_tile * w_bytes              # W2 tile
    e += 2 * (2 * h_pad + o_tile) * w_bytes         # b1/b3 (resident) + b2
    e += 2 * bt * o_tile * x_bytes                  # output blocks
    e += bt * o_tile * 4                            # f32 accumulator scratch
    e += 3 * bt * h_tile * 4                        # a / g / h f32 intermediates
    return e


def _vmem_budget_and_defaults():
    """Generation-aware VMEM budget and default (block_rows, h_tile)."""
    try:
        vmem_cap = int(getattr(pltpu.get_tpu_info(), "vmem_capacity_bytes",
                               64 * 1024 * 1024))
    except Exception:
        vmem_cap = 64 * 1024 * 1024
    if vmem_cap <= 64 * 1024 * 1024:
        # v7x-class: 64 MiB physical VMEM per TC -> leave compiler headroom.
        budget = min(52 * 1024 * 1024, vmem_cap - 8 * 1024 * 1024)
        bt0, ht0 = 512, 256
    else:
        # v5e / v6e: 128 MiB physical VMEM.
        budget = min(100 * 1024 * 1024, vmem_cap - 16 * 1024 * 1024)
        bt0, ht0 = 1024, 512
    return max(budget, 24 * 1024 * 1024), bt0, ht0


def prepare_swiglu_params(params, *, x_dtype=None, block_rows=None,
                          block_h=None, block_o=None):
    """Pad SwiGLU parameters ONCE to lane/MXU-friendly tile sizes.

    Call at model init and reuse the result for every forward pass (keeps the
    per-call path free of full weight-matrix HBM copies). The `_meta` entry
    holds static Python ints (close over it / keep it static under jit).
    """
    if "_meta" in params:
        return params
    w1, b1 = params["w1"], params["b1"]
    w3, b3 = params["w3"], params["b3"]
    w2, b2 = params["w2"], params["b2"]
    in_ndim, hdim = w1.shape
    out_ndim = w2.shape[1]

    w_bytes = jnp.dtype(w1.dtype).itemsize
    x_bytes = jnp.dtype(x_dtype).itemsize if x_dtype is not None else w_bytes

    budget, bt0, ht0 = _vmem_budget_and_defaults()
    if block_rows is not None:
        bt0 = max(8, _round_up(block_rows, 8))
    if block_h is not None:
        ht0 = max(128, _round_up(block_h, 128))

    d_pad = _round_up(in_ndim, 128)
    h_tile = min(ht0, _round_up(hdim, 256))
    o_tile = (_round_up(out_ndim, 128) if block_o is None
              else max(128, _round_up(block_o, 128)))
    bt = bt0

    def est(bt_, ht_, ot_):
        return _vmem_estimate(bt_, d_pad, ht_, _round_up(hdim, ht_), ot_,
                              x_bytes, w_bytes)

    # Shrink tiles until the worst-case (max row tile) working set fits.
    while est(bt, h_tile, o_tile) > budget:
        if h_tile > 256:
            h_tile = _round_up(h_tile // 2, 128)
        elif bt > 256:
            bt = _round_up(bt // 2, 8)
        elif o_tile > 1024:
            o_tile = _round_up(o_tile // 2, 128)
        elif bt > 64:
            bt = _round_up(bt // 2, 8)
        elif h_tile > 128:
            h_tile = 128
        elif o_tile > 256:
            o_tile = _round_up(o_tile // 2, 128)
        elif bt > 8:
            bt = _round_up(bt // 2, 8)
        else:
            break

    h_pad = _round_up(hdim, h_tile)
    o_pad = _round_up(out_ndim, o_tile)

    return {
        "w1": jnp.pad(w1, ((0, d_pad - in_ndim), (0, h_pad - hdim))),
        "w3": jnp.pad(w3, ((0, d_pad - in_ndim), (0, h_pad - hdim))),
        "w2": jnp.pad(w2, ((0, h_pad - hdim), (0, o_pad - out_ndim))),
        "b1": jnp.pad(jnp.reshape(b1, (1, hdim)), ((0, 0), (0, h_pad - hdim))),
        "b3": jnp.pad(jnp.reshape(b3, (1, hdim)), ((0, 0), (0, h_pad - hdim))),
        "b2": jnp.pad(jnp.reshape(b2, (1, out_ndim)),
                      ((0, 0), (0, o_pad - out_ndim))),
        "_meta": {
            "in_ndim": in_ndim, "hdim": hdim, "out_ndim": out_ndim,
            "d_pad": d_pad, "h_pad": h_pad, "o_pad": o_pad,
            "h_tile": h_tile, "o_tile": o_tile, "block_rows": bt,
            "vmem_budget": budget, "w_bytes": w_bytes,
        },
    }


# ---------------------------------------------------------------------------
# Forward wrapper
# ---------------------------------------------------------------------------
def swiglu(x, params):
    """Pallas-TPU SwiGLU forward: x (..., in_ndim) -> (..., out_ndim).

    `params` is either the raw {"w1","b1","w3","b3","w2","b2"} dict (padded on
    the fly) or, preferably, the output of `prepare_swiglu_params` (no weight
    copies on the forward path)."""
    if "_meta" not in params:
        params = prepare_swiglu_params(params, x_dtype=x.dtype)
    meta = params["_meta"]
    in_ndim, out_ndim = meta["in_ndim"], meta["out_ndim"]
    d_pad, h_pad, o_pad = meta["d_pad"], meta["h_pad"], meta["o_pad"]
    h_tile, o_tile = meta["h_tile"], meta["o_tile"]

    *lead, xd = x.shape
    assert xd == in_ndim, (xd, in_ndim)
    rows = math.prod(lead) if lead else 1

    bt = min(meta["block_rows"], _round_up(rows, 8))
    rows_pad = _round_up(rows, bt)

    xf = jnp.reshape(x, (rows, in_ndim))
    x_p = jnp.pad(xf, ((0, rows_pad - rows), (0, d_pad - in_ndim)))

    grid = (rows_pad // bt, o_pad // o_tile, h_pad // h_tile)

    in_specs = [
        pl.BlockSpec((bt, d_pad), lambda i, o, j: (i, 0)),       # x (resident over o, j)
        pl.BlockSpec((d_pad, h_tile), lambda i, o, j: (0, j)),   # W1 hidden tile
        pl.BlockSpec((1, h_pad), lambda i, o, j: (0, 0)),        # b1 (fully resident)
        pl.BlockSpec((d_pad, h_tile), lambda i, o, j: (0, j)),   # W3 hidden tile
        pl.BlockSpec((1, h_pad), lambda i, o, j: (0, 0)),        # b3 (fully resident)
        pl.BlockSpec((h_tile, o_tile), lambda i, o, j: (j, o)),  # W2 tile
        pl.BlockSpec((1, o_tile), lambda i, o, j: (0, o)),       # b2
    ]
    out_spec = pl.BlockSpec((bt, o_tile), lambda i, o, j: (i, o))

    est = _vmem_estimate(bt, d_pad, h_tile, h_pad, o_tile,
                         jnp.dtype(x.dtype).itemsize, meta["w_bytes"])
    vmem_limit = int(min(max(est + (2 << 20), 32 * 1024 * 1024),
                         meta["vmem_budget"]))

    out = pl.pallas_call(
        functools.partial(_swiglu_kernel, h_tile=h_tile),
        out_shape=jax.ShapeDtypeStruct((rows_pad, o_pad), x.dtype),
        grid_spec=pltpu.PrefetchScalarGridSpec(
            num_scalar_prefetch=0,
            grid=grid,
            in_specs=in_specs,
            out_specs=out_spec,
            scratch_shapes=[pltpu.VMEM((bt, o_tile), jnp.float32)],
        ),
        compiler_params=pltpu.CompilerParams(
            dimension_semantics=("parallel", "parallel", "arbitrary"),
            vmem_limit_bytes=vmem_limit,
        ),
    )(x_p, params["w1"], params["b1"], params["w3"], params["b3"],
      params["w2"], params["b2"])

    y = out[:rows, :out_ndim]
    return jnp.reshape(y, (*lead, out_ndim))


# ---------------------------------------------------------------------------
# Reference + test harness
# ---------------------------------------------------------------------------
def swiglu_reference(x, params):
    """Pure-JAX f32 reference replicating the PyTorch module's forward."""
    xf = x.astype(jnp.float32)
    a = xf @ params["w1"].astype(jnp.float32) + params["b1"].astype(jnp.float32)
    g = xf @ params["w3"].astype(jnp.float32) + params["b3"].astype(jnp.float32)
    h = jax.nn.silu(a) * g
    return h @ params["w2"].astype(jnp.float32) + params["b2"].astype(jnp.float32)


def make_params(key, in_ndim, out_ndim=None, dtype=jnp.float32):
    if out_ndim is None:
        out_ndim = in_ndim
    hdim = int(in_ndim * 4 * (2 / 3))
    k1, k2, k3, k4, k5, k6 = jax.random.split(key, 6)

    def w(k, shape, s):
        return (jax.random.normal(k, shape, dtype=jnp.float32) * s).astype(dtype)

    s_in = 1.0 / math.sqrt(in_ndim)
    s_h = 1.0 / math.sqrt(hdim)
    # Weights pre-transposed to (in, out) so the kernel does x @ W + b (matches
    # torch.nn.Linear's y = x @ W.T + b semantics).
    return {
        "w1": w(k1, (in_ndim, hdim), s_in), "b1": w(k2, (hdim,), s_in),
        "w3": w(k3, (in_ndim, hdim), s_in), "b3": w(k4, (hdim,), s_in),
        "w2": w(k5, (hdim, out_ndim), s_h), "b2": w(k6, (out_ndim,), s_h),
    }


if __name__ == "__main__":
    key = jax.random.PRNGKey(0)
    kx, kp, kx2, kp2 = jax.random.split(key, 4)

    # ---- test 1: f32, module-implied small shape (B=2, S=8, in=32 -> hdim=85) --
    B, S, in_ndim = 2, 8, 32
    x = jax.random.normal(kx, (B, S, in_ndim), dtype=jnp.float32)
    params = make_params(kp, in_ndim)
    prepared = prepare_swiglu_params(params, x_dtype=x.dtype)   # pad ONCE at init

    y = jax.block_until_ready(swiglu(x, prepared))
    y_ref = swiglu_reference(x, params)
    assert y.shape == (B, S, in_ndim)
    assert jnp.allclose(y, y_ref, rtol=2e-2, atol=2e-2), \
        float(jnp.max(jnp.abs(y - y_ref)))

    # ---- test 2: bf16 weights/activations with forced small tiles so the full
    # 3-D grid (row x out x hidden-reduction) and the f32 accumulator path run. --
    in2, out2 = 96, 192          # hdim = 256 -> two 128-wide hidden tiles
    x2 = jax.random.normal(kx2, (4, 4, in2), dtype=jnp.bfloat16)
    params2 = make_params(kp2, in2, out_ndim=out2, dtype=jnp.bfloat16)
    prepared2 = prepare_swiglu_params(params2, x_dtype=x2.dtype,
                                      block_rows=8, block_h=128, block_o=128)
    y2 = jax.block_until_ready(swiglu(x2, prepared2))
    y2_ref = swiglu_reference(x2, params2)
    assert y2.shape == (4, 4, out2)
    assert jnp.allclose(y2.astype(jnp.float32), y2_ref, rtol=5e-2, atol=5e-2), \
        float(jnp.max(jnp.abs(y2.astype(jnp.float32) - y2_ref)))

    print("KERNEL_OK")
</pallas_src>

<mosaic_0001>
module attributes {stable_mosaic.version = 11 : i64} {
  func.func @_swiglu_kernel(%arg0: i32, %arg1: i32, %arg2: i32, %arg3: memref<16x128xf32, #tpu.memory_space<vmem>>, %arg4: memref<128x256xf32, #tpu.memory_space<vmem>>, %arg5: memref<1x256xf32, #tpu.memory_space<vmem>>, %arg6: memref<128x256xf32, #tpu.memory_space<vmem>>, %arg7: memref<1x256xf32, #tpu.memory_space<vmem>>, %arg8: memref<256x128xf32, #tpu.memory_space<vmem>>, %arg9: memref<1x128xf32, #tpu.memory_space<vmem>>, %arg10: memref<16x128xf32, #tpu.memory_space<vmem>>, %arg11: memref<16x128xf32, #tpu.memory_space<vmem>>) attributes {dimension_semantics = [#tpu.dimension_semantics<parallel>, #tpu.dimension_semantics<parallel>, #tpu.dimension_semantics<arbitrary>], iteration_bounds = array<i64: 1, 1, 1>, scalar_prefetch = 0 : i64, scratch_operands = 1 : i64, tpu.core_type = #tpu.core_type<tc>, window_params = [{transform_indices = @transform_0, window_bounds = array<i64: 16, 128>}, {transform_indices = @transform_1, window_bounds = array<i64: 128, 256>}, {pipeline_mode = #tpu.pipeline_mode<synchronous>, transform_indices = @transform_2, window_bounds = array<i64: 1, 256>}, {transform_indices = @transform_3, window_bounds = array<i64: 128, 256>}, {pipeline_mode = #tpu.pipeline_mode<synchronous>, transform_indices = @transform_4, window_bounds = array<i64: 1, 256>}, {transform_indices = @transform_5, window_bounds = array<i64: 256, 128>}, {transform_indices = @transform_6, window_bounds = array<i64: 1, 128>}, {transform_indices = @transform_7, window_bounds = array<i64: 16, 128>}]} {
    %c0_i32 = arith.constant 0 : i32
    %0 = arith.cmpi eq, %arg2, %c0_i32 : i32
    %1 = arith.extui %0 : i1 to i32
    %c0_i32_0 = arith.constant 0 : i32
    %2 = arith.cmpi ne, %1, %c0_i32_0 : i32
    scf.if %2 {
      %cst_19 = arith.constant 0.000000e+00 : f32
      %33 = vector.broadcast %cst_19 : f32 to vector<16x128xf32>
      %c0_20 = arith.constant 0 : index
      %c0_21 = arith.constant 0 : index
      %34 = vector.load %arg11[%c0_20, %c0_21] : memref<16x128xf32, #tpu.memory_space<vmem>>, vector<16x128xf32>
      tpu.vector_store %arg11[%c0_20, %c0_21], %33 {strides = array<i32>} : memref<16x128xf32, #tpu.memory_space<vmem>>, vector<16x128xf32>,
    } else {
    }
    %c256_i32 = arith.constant 256 : i32
    %3 = arith.muli %arg2, %c256_i32 : i32
    %4 = tpu.assume_multiple %3, 256 : i32
    %c0 = arith.constant 0 : index
    %5 = arith.index_cast %4 : i32 to index
    %6 = vector.load %arg5[%c0, %5] : memref<1x256xf32, #tpu.memory_space<vmem>>, vector<1x256xf32>
    %c0_1 = arith.constant 0 : index
    %7 = arith.index_cast %4 : i32 to index
    %8 = vector.load %arg7[%c0_1, %7] : memref<1x256xf32, #tpu.memory_space<vmem>>, vector<1x256xf32>
    %c0_2 = arith.constant 0 : index
    %c0_3 = arith.constant 0 : index
    %9 = vector.load %arg3[%c0_2, %c0_3] : memref<16x128xf32, #tpu.memory_space<vmem>>, vector<16x128xf32>
    %c0_4 = arith.constant 0 : index
    %c0_5 = arith.constant 0 : index
    %10 = vector.load %arg4[%c0_4, %c0_5] : memref<128x256xf32, #tpu.memory_space<vmem>>, vector<128x256xf32>
    %cst = arith.constant dense<0.000000e+00> : vector<16x256xf32>
    %11 = tpu.matmul %9, %10, %cst {dimension_numbers = #tpu.dot_dimension_numbers<[1], [0], [0], [1], [0, 0, 1, 1], [], []>} : vector<16x128xf32>, vector<128x256xf32>, vector<16x256xf32> -> vector<16x256xf32>
    %12 = vector.broadcast %6 : vector<1x256xf32> to vector<16x256xf32>
    %13 = arith.addf %11, %12 : vector<16x256xf32>
    %c0_6 = arith.constant 0 : index
    %c0_7 = arith.constant 0 : index
    %14 = vector.load %arg6[%c0_6, %c0_7] : memref<128x256xf32, #tpu.memory_space<vmem>>, vector<128x256xf32>
    %cst_8 = arith.constant dense<0.000000e+00> : vector<16x256xf32>
    %15 = tpu.matmul %9, %14, %cst_8 {dimension_numbers = #tpu.dot_dimension_numbers<[1], [0], [0], [1], [0, 0, 1, 1], [], []>} : vector<16x128xf32>, vector<128x256xf32>, vector<16x256xf32> -> vector<16x256xf32>
    %16 = vector.broadcast %8 : vector<1x256xf32> to vector<16x256xf32>
    %17 = arith.addf %15, %16 : vector<16x256xf32>
    %18 = arith.negf %13 : vector<16x256xf32>
    %19 = math.exp %18 : vector<16x256xf32>
    %cst_9 = arith.constant 1.000000e+00 : f32
    %20 = vector.broadcast %cst_9 : f32 to vector<16x256xf32>
    %21 = arith.addf %20, %19 : vector<16x256xf32>
    %22 = arith.divf %20, %21 : vector<16x256xf32>
    %23 = arith.mulf %13, %22 : vector<16x256xf32>
    %24 = arith.mulf %23, %17 : vector<16x256xf32>
    %c0_10 = arith.constant 0 : index
    %c0_11 = arith.constant 0 : index
    %25 = vector.load %arg11[%c0_10, %c0_11] : memref<16x128xf32, #tpu.memory_space<vmem>>, vector<16x128xf32>
    %c0_12 = arith.constant 0 : index
    %c0_13 = arith.constant 0 : index
    %26 = vector.load %arg8[%c0_12, %c0_13] : memref<256x128xf32, #tpu.memory_space<vmem>>, vector<256x128xf32>
    %cst_14 = arith.constant dense<0.000000e+00> : vector<16x128xf32>
    %27 = tpu.matmul %24, %26, %cst_14 {dimension_numbers = #tpu.dot_dimension_numbers<[1], [0], [0], [1], [0, 0, 1, 1], [], []>} : vector<16x256xf32>, vector<256x128xf32>, vector<16x128xf32> -> vector<16x128xf32>
    %28 = arith.addf %25, %27 : vector<16x128xf32>
    %c0_15 = arith.constant 0 : index
    %c0_16 = arith.constant 0 : index
    %29 = vector.load %arg11[%c0_15, %c0_16] : memref<16x128xf32, #tpu.memory_space<vmem>>, vector<16x128xf32>
    tpu.vector_store %arg11[%c0_15, %c0_16], %28 {strides = array<i32>} : memref<16x128xf32, #tpu.memory_space<vmem>>, vector<16x128xf32>,
    %c0_i32_17 = arith.constant 0 : i32
    %30 = arith.cmpi eq, %arg2, %c0_i32_17 : i32
    %31 = arith.extui %30 : i1 to i32
    %c0_i32_18 = arith.constant 0 : i32
    %32 = arith.cmpi ne, %31, %c0_i32_18 : i32
    scf.if %32 {
      %c0_19 = arith.constant 0 : index
      %c0_20 = arith.constant 0 : index
      %33 = vector.load %arg11[%c0_19, %c0_20] : memref<16x128xf32, #tpu.memory_space<vmem>>, vector<16x128xf32>
      %c0_21 = arith.constant 0 : index
      %c0_22 = arith.constant 0 : index
      %34 = vector.load %arg9[%c0_21, %c0_22] : memref<1x128xf32, #tpu.memory_space<vmem>>, vector<1x128xf32>
      %35 = vector.broadcast %34 : vector<1x128xf32> to vector<16x128xf32>
      %36 = arith.addf %33, %35 : vector<16x128xf32>
      %c0_23 = arith.constant 0 : index
      %c0_24 = arith.constant 0 : index
      %37 = vector.load %arg10[%c0_23, %c0_24] : memref<16x128xf32, #tpu.memory_space<vmem>>, vector<16x128xf32>
      tpu.vector_store %arg10[%c0_23, %c0_24], %36 {strides = array<i32>} : memref<16x128xf32, #tpu.memory_space<vmem>>, vector<16x128xf32>,
    } else {
    }
    return
  }
  func.func @transform_0(%arg0: i32, %arg1: i32, %arg2: i32) -> (i32, i32) {
    %c0_i32 = arith.constant 0 : i32
    %c0_i32_0 = arith.constant 0 : i32
    return %arg0, %c0_i32 : i32, i32
  }
  func.func @transform_1(%arg0: i32, %arg1: i32, %arg2: i32) -> (i32, i32) {
    %c0_i32 = arith.constant 0 : i32
    %c0_i32_0 = arith.constant 0 : i32
    return %c0_i32, %arg2 : i32, i32
  }
  func.func @transform_2(%arg0: i32, %arg1: i32, %arg2: i32) -> (i32, i32) {
    %c0_i32 = arith.constant 0 : i32
    %c0_i32_0 = arith.constant 0 : i32
    %c0_i32_1 = arith.constant 0 : i32
    return %c0_i32, %c0_i32_0 : i32, i32
  }
  func.func @transform_3(%arg0: i32, %arg1: i32, %arg2: i32) -> (i32, i32) {
    %c0_i32 = arith.constant 0 : i32
    %c0_i32_0 = arith.constant 0 : i32
    return %c0_i32, %arg2 : i32, i32
  }
  func.func @transform_4(%arg0: i32, %arg1: i32, %arg2: i32) -> (i32, i32) {
    %c0_i32 = arith.constant 0 : i32
    %c0_i32_0 = arith.constant 0 : i32
    %c0_i32_1 = arith.constant 0 : i32
    return %c0_i32, %c0_i32_0 : i32, i32
  }
  func.func @transform_5(%arg0: i32, %arg1: i32, %arg2: i32) -> (i32, i32) {
    %c0_i32 = arith.constant 0 : i32
    return %arg2, %arg1 : i32, i32
  }
  func.func @transform_6(%arg0: i32, %arg1: i32, %arg2: i32) -> (i32, i32) {
    %c0_i32 = arith.constant 0 : i32
    %c0_i32_0 = arith.constant 0 : i32
    return %c0_i32, %arg1 : i32, i32
  }
  func.func @transform_7(%arg0: i32, %arg1: i32, %arg2: i32) -> (i32, i32) {
    %c0_i32 = arith.constant 0 : i32
    return %arg0, %arg1 : i32, i32
  }
}

</mosaic_0001>

<bundles_post_ra>
// kernel: tpu_custom_call.1
= control target key start
LH: loop header
LB: loop body
LE: loop exit
PB: predicated region body
PF: predicated region fallthrough
CT: control target
= control target key end

     0   :  { %12 = vsyncpa [#allocation4], 0  ;;  %s820_s0 = inlined_call_operand.hbm [shape: f32[16,128], index: 0, kind: input, shape index: {}]   ;;  %s821_s1 = inlined_call_operand.hbm [shape: f32[128,256], index: 1, kind: input, shape index: {}]   ;;  %s822_s2 = inlined_call_operand.hbm [shape: f32[1,256], index: 2, kind: input, shape index: {}]   ;;  %s823_s3 = inlined_call_operand.hbm [shape: f32[128,256], index: 3, kind: input, shape index: {}]   ;;  %s824_s4 = inlined_call_operand.vmem [shape: f32[1,256], index: 4, kind: input, shape index: {}]   ;;  %s825_s5 = inlined_call_operand.hbm [shape: f32[256,128], index: 5, kind: input, shape index: {}]   ;;  %s826_s6 = inlined_call_operand.vmem [shape: f32[1,128], index: 6, kind: input, shape index: {}]   ;;  %s827_s7 = inlined_call_operand.hbm [shape: f32[16,128], index: 7, kind: output, shape index: {}]  }
   0x1   :  { %13 = vsyncpa [#allocation7], 0 }
   0x2   :  { %14 = vsyncpa [#allocation10], 0  ;;  %s33_s26 = sshll.u32 %s821_s1, 4  ;;  %s34_s26 = int_to_ptr.hbm [resolvable:$true] %s33_s26 }
   0x3   :  { %15 = vsyncpa [#allocation5], 0  ;;  %s703_s27 = smov [#allocation6]   ;;  %s57_s8 = sshll.u32 %s823_s3, 4  ;;  %s58_s8 = int_to_ptr.hbm [resolvable:$true] %s57_s8 }
   0x4   :  { %s35_s28 = sshll.u32 %s703_s27, 4  ;;  %s704_s9 = smov 256   ;;  %s36_s28 = int_to_ptr.vmem [resolvable:$true] %s35_s28 }
   0x5   :  { %s705_s10 = smov 16   ;;  %s706_s11 = smov [#allocation9]  }
   0x6   :  { %41 = dma.hbm_to_vmem [thread:$0]  %s34_s26, 4096, %s36_s28, [#allocation7], %s704_s9, %s704_s9, %s705_s10  }
   0x7   :  { %s59_s12 = sshll.u32 %s706_s11, 4  ;;  %s20_s15 = sshll.u32 %s820_s0, 4  ;;  %s60_s12 = int_to_ptr.vmem [resolvable:$true] %s59_s12  ;;  %s21_s15 = int_to_ptr.hbm [resolvable:$true] %s20_s15 }
   0x8   :  { %65 = dma.hbm_to_vmem [thread:$0]  %s58_s8, 4096, %s60_s12, [#allocation10], %s704_s9, %s704_s9, %s705_s10  }
   0x9   :  { %s707_s1 = smov [#allocation3]   ;;  %s47_s3 = sshll.u32 %s822_s2, 4  ;;  %s48_s3 = int_to_ptr.hbm [resolvable:$true] %s47_s3 }
   0xa   :  { %s22_s16 = sshll.u32 %s707_s1, 4  ;;  %s708_s19 = smov 128   ;;  %s23_s16 = int_to_ptr.vmem [resolvable:$true] %s22_s16 }
   0xb   :  { %s709_s20 = smov 8   ;;  %s710_s21 = smov [#allocation8]  }
   0xc   :  { %28 = dma.hbm_to_vmem [thread:$0]  %s21_s15, 256, %s23_s16, [#allocation4], %s708_s19, %s708_s19, %s709_s20  }
   0xd   :  { %s49_s22 = sshll.u32 %s710_s21, 4  ;;  %s72_s24 = sshll.u32 %s825_s5, 4  ;;  %s50_s22 = int_to_ptr.vmem [resolvable:$true] %s49_s22  ;;  %s73_s24 = int_to_ptr.hbm [resolvable:$true] %s72_s24 }
   0xe   :  { %52 = dma.hbm_to_vmem [thread:$0]  %s48_s3, 32, %s50_s22, [#allocation7]  }
   0xf   :  { %s711_s25 = smov [#allocation11]  }
  0x10   :  { %s74_s26 = sshll.u32 %s711_s25, 4  ;;  %s75_s26 = int_to_ptr.vmem [resolvable:$true] %s74_s26 }
  0x11   :  { %80 = dma.hbm_to_vmem [thread:$0]  %s73_s24, 4096, %s75_s26, [#allocation10], %s708_s19, %s708_s19, %s709_s20  }
  0x12   :  { %695 = dma.done.wait [#allocation4], 256  }
  0x13   :  { %696 = vsyncadd [#allocation4], 4294967040 }
  0x14   :  { %697 = dma.done.wait [#allocation7], 4128  }
  0x15   :  { %698 = vsyncadd [#allocation7], 4294963168 }
  0x16   :  { %699 = dma.done.wait [#allocation10], 8192  }
  0x17   :  { %700 = vsyncadd [#allocation10], 4294959104  ;;  %v148_v0 = vld [vmem:[#allocation6 + $0xf0] sm:$0xff]  ;;  %v149_v1 = vld [vmem:[#allocation6 + $0xf8] sm:$0xff]  ;;  %s712_s28 = smov [#allocation12]   ;;  %s471_s9 = sshll.u32 %s827_s7, 4  ;;  %s472_s9 = int_to_ptr.hbm [resolvable:$true] %s471_s9 }
  0x18   :  { %v146_v2 = vld [vmem:[#allocation6 + $0xe0] sm:$0xff]  ;;  %155 = vmatpush.msra.mxu0 %v148_v0  ;;  %178 = vmatpush.msra.mxu1 %v149_v1  ;;  %v147_v3 = vld [vmem:[#allocation6 + $0xe8] sm:$0xff]  ;;  %v144_v4 = vld [vmem:[#allocation6 + $0xd0] sm:$0xff]  ;;  %s469_s29 = sshll.u32 %s712_s28, 4  ;;  %s470_s29 = int_to_ptr.vmem [resolvable:$true] %s469_s29 }
  0x19   :  { %v145_v5 = vld [vmem:[#allocation6 + $0xd8] sm:$0xff]  ;;  %v142_v6 = vld [vmem:[#allocation6 + $0xc0] sm:$0xff]  ;;  %v143_v7 = vld [vmem:[#allocation6 + $0xc8] sm:$0xff] }
  0x1a   :  { %156 = vmatpush.msra.mxu0 %v146_v2  ;;  %179 = vmatpush.msra.mxu1 %v147_v3  ;;  %v140_v8 = vld [vmem:[#allocation6 + $0xb0] sm:$0xff]  ;;  %v141_v9 = vld [vmem:[#allocation6 + $0xb8] sm:$0xff]  ;;  %v138_v10 = vld [vmem:[#allocation6 + $0xa0] sm:$0xff] }
  0x1b   :  { %v139_v11 = vld [vmem:[#allocation6 + $0xa8] sm:$0xff]  ;;  %v231_v12 = vld [vmem:[#allocation9 + $0xf0] sm:$0xff]  ;;  %v232_v14 = vld [vmem:[#allocation9 + $0xf8] sm:$0xff] }
  0x1c   :  { %157 = vmatpush.msra.mxu0 %v144_v4  ;;  %180 = vmatpush.msra.mxu1 %v145_v5  ;;  %v136_v13 = vld [vmem:[#allocation6 + $0x90] sm:$0xff]  ;;  %v137_v15 = vld [vmem:[#allocation6 + $0x98] sm:$0xff]  ;;  %v229_v16 = vld [vmem:[#allocation9 + $0xe0] sm:$0xff] }
  0x1d   :  { %238 = vmatpush.msra.mxu2 %v231_v12  ;;  %261 = vmatpush.msra.mxu3 %v232_v14  ;;  %v230_v17 = vld [vmem:[#allocation9 + $0xe8] sm:$0xff]  ;;  %v227_v18 = vld [vmem:[#allocation9 + $0xd0] sm:$0xff]  ;;  %v228_v19 = vld [vmem:[#allocation9 + $0xd8] sm:$0xff] }
  0x1e   :  { %158 = vmatpush.msra.mxu0 %v142_v6  ;;  %181 = vmatpush.msra.mxu1 %v143_v7  ;;  %v134_v20 = vld [vmem:[#allocation6 + $0x80] sm:$0xff]  ;;  %v135_v21 = vld [vmem:[#allocation6 + $0x88] sm:$0xff]  ;;  %v132_v24 = vld [vmem:[#allocation6 + $0x70] sm:$0xff] }
  0x1f   :  { %239 = vmatpush.msra.mxu2 %v229_v16  ;;  %262 = vmatpush.msra.mxu3 %v230_v17  ;;  %v225_v22 = vld [vmem:[#allocation9 + $0xc0] sm:$0xff]  ;;  %v226_v23 = vld [vmem:[#allocation9 + $0xc8] sm:$0xff]  ;;  %v133_v25 = vld [vmem:[#allocation6 + $0x78] sm:$0xff] }
  0x20   :  { %159 = vmatpush.msra.mxu0 %v140_v8  ;;  %182 = vmatpush.msra.mxu1 %v141_v9  ;;  %v223_v26 = vld [vmem:[#allocation9 + $0xb0] sm:$0xff]  ;;  %v224_v27 = vld [vmem:[#allocation9 + $0xb8] sm:$0xff]  ;;  %v131_v29 = vld [vmem:[#allocation6 + $0x68] sm:$0xff] }
  0x21   :  { %240 = vmatpush.msra.mxu2 %v227_v18  ;;  %263 = vmatpush.msra.mxu3 %v228_v19  ;;  %v130_v28 = vld [vmem:[#allocation6 + $0x60] sm:$0xff]  ;;  %v222_v31 = vld [vmem:[#allocation9 + $0xa8] sm:$0xff]  ;;  %v129_v33 = vld [vmem:[#allocation6 + $0x58] sm:$0xff] }
  0x22   :  { %160 = vmatpush.msra.mxu0 %v138_v10  ;;  %183 = vmatpush.msra.mxu1 %v139_v11  ;;  %v221_v30 = vld [vmem:[#allocation9 + $0xa0] sm:$0xff]  ;;  %v128_v32 = vld [vmem:[#allocation6 + $0x50] sm:$0xff]  ;;  %v220_v35 = vld [vmem:[#allocation9 + $0x98] sm:$0xff] }
  0x23   :  { %241 = vmatpush.msra.mxu2 %v225_v22  ;;  %264 = vmatpush.msra.mxu3 %v226_v23  ;;  %v219_v34 = vld [vmem:[#allocation9 + $0x90] sm:$0xff]  ;;  %v126_v36 = vld [vmem:[#allocation6 + $0x40] sm:$0xff]  ;;  %v127_v37 = vld [vmem:[#allocation6 + $0x48] sm:$0xff] }
  0x24   :  { %161 = vmatpush.msra.mxu0 %v136_v13  ;;  %184 = vmatpush.msra.mxu1 %v137_v15  ;;  %v217_v38 = vld [vmem:[#allocation9 + $0x80] sm:$0xff]  ;;  %v218_v39 = vld [vmem:[#allocation9 + $0x88] sm:$0xff]  ;;  %v125_v41 = vld [vmem:[#allocation6 + $0x38] sm:$0xff] }
  0x25   :  { %242 = vmatpush.msra.mxu2 %v223_v26  ;;  %265 = vmatpush.msra.mxu3 %v224_v27  ;;  %v124_v40 = vld [vmem:[#allocation6 + $0x30] sm:$0xff]  ;;  %v216_v43 = vld [vmem:[#allocation9 + $0x78] sm:$0xff]  ;;  %v123_v45 = vld [vmem:[#allocation6 + $0x28] sm:$0xff] }
  0x26   :  { %162 = vmatpush.msra.mxu0 %v134_v20  ;;  %185 = vmatpush.msra.mxu1 %v135_v21  ;;  %v215_v42 = vld [vmem:[#allocation9 + $0x70] sm:$0xff]  ;;  %v122_v44 = vld [vmem:[#allocation6 + $0x20] sm:$0xff]  ;;  %v214_v47 = vld [vmem:[#allocation9 + $0x68] sm:$0xff] }
  0x27   :  { %243 = vmatpush.msra.mxu2 %v221_v30  ;;  %266 = vmatpush.msra.mxu3 %v222_v31  ;;  %v213_v46 = vld [vmem:[#allocation9 + $0x60] sm:$0xff]  ;;  %v120_v48 = vld [vmem:[#allocation6 + $0x10] sm:$0xff]  ;;  %v121_v49 = vld [vmem:[#allocation6 + $0x18] sm:$0xff] }
  0x28   :  { %163 = vmatpush.msra.mxu0 %v132_v24  ;;  %186 = vmatpush.msra.mxu1 %v133_v25  ;;  %v211_v50 = vld [vmem:[#allocation9 + $0x50] sm:$0xff]  ;;  %v212_v51 = vld [vmem:[#allocation9 + $0x58] sm:$0xff]  ;;  %v119_v53 = vld [vmem:[#allocation6 + $0x8] sm:$0xff] }
  0x29   :  { %244 = vmatpush.msra.mxu2 %v219_v34  ;;  %267 = vmatpush.msra.mxu3 %v220_v35  ;;  %v118_v52 = vld [vmem:[#allocation6] sm:$0xff]  ;;  %v116_v54 = vld [vmem:[#allocation3] sm:$0xff]  ;;  %v117_v63 = vld [vmem:[#allocation3 + $0x8] sm:$0xff] }
  0x2a   :  { %164 = vmatpush.msra.mxu0 %v130_v28  ;;  %187 = vmatpush.msra.mxu1 %v131_v29  ;;  %v209_v55 = vld [vmem:[#allocation9 + $0x40] sm:$0xff]  ;;  %v210_v56 = vld [vmem:[#allocation9 + $0x48] sm:$0xff]  ;;  %v207_v57 = vld [vmem:[#allocation9 + $0x30] sm:$0xff] }
  0x2b   :  { %245 = vmatpush.msra.mxu2 %v217_v38  ;;  %268 = vmatpush.msra.mxu3 %v218_v39  ;;  %v208_v58 = vld [vmem:[#allocation9 + $0x38] sm:$0xff]  ;;  %v205_v59 = vld [vmem:[#allocation9 + $0x20] sm:$0xff]  ;;  %v206_v60 = vld [vmem:[#allocation9 + $0x28] sm:$0xff] }
  0x2c   :  { %165 = vmatpush.msra.mxu0 %v128_v32  ;;  %188 = vmatpush.msra.mxu1 %v129_v33  ;;  %v203_v61 = vld [vmem:[#allocation9 + $0x10] sm:$0xff]  ;;  %v204_v62 = vld [vmem:[#allocation9 + $0x18] sm:$0xff]  ;;  %v201_v0 = vld [vmem:[#allocation9] sm:$0xff] }
  0x2d   :  { %246 = vmatpush.msra.mxu2 %v215_v42  ;;  %269 = vmatpush.msra.mxu3 %v216_v43  ;;  %v202_v1 = vld [vmem:[#allocation9 + $0x8] sm:$0xff]  ;;  %v385_v2 = vld [vmem:[#allocation11 + $0x78] sm:$0xff]  ;;  %v384_v4 = vld [vmem:[#allocation11 + $0x70] sm:$0xff] }
  0x2e   :  { %166 = vmatpush.msra.mxu0 %v126_v36  ;;  %189 = vmatpush.msra.mxu1 %v127_v37  ;;  %v401_v3 = vld [vmem:[#allocation11 + $0xf8] sm:$0xff]  ;;  %v400_v5 = vld [vmem:[#allocation11 + $0xf0] sm:$0xff]  ;;  %v383_v6 = vld [vmem:[#allocation11 + $0x68] sm:$0xff] }
  0x2f   :  { %247 = vmatpush.msra.mxu2 %v213_v46  ;;  %270 = vmatpush.msra.mxu3 %v214_v47  ;;  %v399_v7 = vld [vmem:[#allocation11 + $0xe8] sm:$0xff]  ;;  %v382_v8 = vld [vmem:[#allocation11 + $0x60] sm:$0xff]  ;;  %v381_v10 = vld [vmem:[#allocation11 + $0x58] sm:$0xff] }
  0x30   :  { %167 = vmatpush.msra.mxu0 %v124_v40  ;;  %190 = vmatpush.msra.mxu1 %v125_v41  ;;  %v398_v9 = vld [vmem:[#allocation11 + $0xe0] sm:$0xff]  ;;  %v397_v11 = vld [vmem:[#allocation11 + $0xd8] sm:$0xff]  ;;  %v380_v12 = vld [vmem:[#allocation11 + $0x50] sm:$0xff] }
  0x31   :  { %248 = vmatpush.msra.mxu2 %v211_v50  ;;  %271 = vmatpush.msra.mxu3 %v212_v51  ;;  %v396_v13 = vld [vmem:[#allocation11 + $0xd0] sm:$0xff]  ;;  %v379_v14 = vld [vmem:[#allocation11 + $0x48] sm:$0xff]  ;;  %v378_v16 = vld [vmem:[#allocation11 + $0x40] sm:$0xff] }
  0x32   :  { %168 = vmatpush.msra.mxu0 %v122_v44  ;;  %191 = vmatpush.msra.mxu1 %v123_v45  ;;  %v395_v15 = vld [vmem:[#allocation11 + $0xc8] sm:$0xff]  ;;  %v394_v17 = vld [vmem:[#allocation11 + $0xc0] sm:$0xff]  ;;  %v377_v18 = vld [vmem:[#allocation11 + $0x38] sm:$0xff] }
  0x33   :  { %249 = vmatpush.msra.mxu2 %v209_v55  ;;  %272 = vmatpush.msra.mxu3 %v210_v56  ;;  %v393_v19 = vld [vmem:[#allocation11 + $0xb8] sm:$0xff]  ;;  %v376_v20 = vld [vmem:[#allocation11 + $0x30] sm:$0xff]  ;;  %v375_v23 = vld [vmem:[#allocation11 + $0x28] sm:$0xff] }
  0x34   :  { %169 = vmatpush.msra.mxu0 %v120_v48  ;;  %192 = vmatpush.msra.mxu1 %v121_v49  ;;  %v392_v21 = vld [vmem:[#allocation11 + $0xb0] sm:$0xff]  ;;  %v113_v22 = vld [vmem:[#allocation8] sm:$0x3]  ;;  %v391_v24 = vld [vmem:[#allocation11 + $0xa8] sm:$0xff] }
  0x35   :  { %250 = vmatpush.msra.mxu2 %v207_v57  ;;  %273 = vmatpush.msra.mxu3 %v208_v58  ;;  %v151_v25 = vperm.slane %v113_v22, 0  ;;  %v152_v26 = vperm.slane %v113_v22, 1  ;;  %v374_v27 = vld [vmem:[#allocation11 + $0x20] sm:$0xff]  ;;  %v373_v29 = vld [vmem:[#allocation11 + $0x18] sm:$0xff]  ;;  %v372_v35 = vld [vmem:[#allocation11 + $0x10] sm:$0xff] }
  0x36   :  { %170 = vmatpush.msra.mxu0 %v118_v52  ;;  %193 = vmatpush.msra.mxu1 %v119_v53  ;;  %v390_v28 = vld [vmem:[#allocation11 + $0xa0] sm:$0xff]  ;;  %v389_v30 = vld [vmem:[#allocation11 + $0x98] sm:$0xff]  ;;  %v388_v36 = vld [vmem:[#allocation11 + $0x90] sm:$0xff] }
  0x37   :  { %171 = vmatmul.f32.vlgmr.msra.gmra.mxu0 %v116_v54  ;;  %194 = vmatmul.f32.vlgmr.msra.gmra.mxu1 %v116_v54  ;;  %v371_v39 = vld [vmem:[#allocation11 + $0x8] sm:$0xff]  ;;  %v370_v41 = vld [vmem:[#allocation11] sm:$0xff] }
  0x38   :  { %251 = vmatpush.msra.mxu2 %v205_v59  ;;  %274 = vmatpush.msra.mxu3 %v206_v60  ;;  %v387_v40 = vld [vmem:[#allocation11 + $0x88] sm:$0xff]  ;;  %v386_v42 = vld [vmem:[#allocation11 + $0x80] sm:$0xff] }
  0x39   :  { %402 = vmatpush.msrb.mxu0 %v385_v2  ;;  %425 = vmatpush.msrb.mxu1 %v401_v3  ;;  %v791_v58 = vld [vmem:[%s824_s4] sm:$0x3] }
  0x3a   :  { %252 = vmatpush.msra.mxu2 %v203_v61  ;;  %275 = vmatpush.msra.mxu3 %v204_v62 }
  0x3b   :  { %403 = vmatpush.msrb.mxu0 %v384_v4  ;;  %426 = vmatpush.msrb.mxu1 %v400_v5 }
  0x3c   :  { %253 = vmatpush.msra.mxu2 %v201_v0  ;;  %276 = vmatpush.msra.mxu3 %v202_v1 }
  0x3d   :  { %254 = vmatmul.f32.vlgmr.msra.gmra.mxu2 %v116_v54  ;;  %277 = vmatmul.f32.vlgmr.msra.gmra.mxu3 %v116_v54 }
  0x3e   :  { %492 = vmatpush.msrb.mxu2 %v385_v2  ;;  %508 = vmatpush.msrb.mxu3 %v401_v3  ;;  %v234_v2 = vperm.slane %v791_v58, 0 }
  0x3f   :  { %174 = vmatmul.f32.gmra.mxu0 %v117_v63  ;;  %197 = vmatmul.f32.gmra.mxu1 %v117_v63 }
  0x40   :  { %493 = vmatpush.msrb.mxu2 %v384_v4  ;;  %509 = vmatpush.msrb.mxu3 %v400_v5 }
  0x41   :  { %404 = vmatpush.msrb.mxu0 %v383_v6  ;;  %427 = vmatpush.msrb.mxu1 %v399_v7 }
  0x42   :  { %494 = vmatpush.msrb.mxu2 %v383_v6  ;;  %510 = vmatpush.msrb.mxu3 %v399_v7 }
  0x43   :  { %405 = vmatpush.msrb.mxu0 %v382_v8  ;;  %428 = vmatpush.msrb.mxu1 %v398_v9 }
  0x44   :  { %495 = vmatpush.msrb.mxu2 %v382_v8  ;;  %511 = vmatpush.msrb.mxu3 %v398_v9  ;;  %v235_v8 = vperm.slane %v791_v58, 1 }
  0x45   :  { %257 = vmatmul.f32.gmra.mxu2 %v117_v63  ;;  %280 = vmatmul.f32.gmra.mxu3 %v117_v63 }
  0x46   :  { %406 = vmatpush.msrb.mxu0 %v381_v10  ;;  %429 = vmatpush.msrb.mxu1 %v397_v11 }
  0x47   :  { %496 = vmatpush.msrb.mxu2 %v381_v10  ;;  %512 = vmatpush.msrb.mxu3 %v397_v11 }
  0x48   :  { %407 = vmatpush.msrb.mxu0 %v380_v12  ;;  %430 = vmatpush.msrb.mxu1 %v396_v13 }
  0x49   :  { %497 = vmatpush.msrb.mxu2 %v380_v12  ;;  %513 = vmatpush.msrb.mxu3 %v396_v13 }
  0x4a   :  { %408 = vmatpush.msrb.mxu0 %v379_v14  ;;  %431 = vmatpush.msrb.mxu1 %v395_v15 }
  0x4b   :  { %498 = vmatpush.msrb.mxu2 %v379_v14  ;;  %514 = vmatpush.msrb.mxu3 %v395_v15 }
  0x4c   :  { %409 = vmatpush.msrb.mxu0 %v378_v16  ;;  %432 = vmatpush.msrb.mxu1 %v394_v17 }
  0x4d   :  { %499 = vmatpush.msrb.mxu2 %v378_v16  ;;  %515 = vmatpush.msrb.mxu3 %v394_v17 }
  0x4e   :  { %410 = vmatpush.msrb.mxu0 %v377_v18  ;;  %433 = vmatpush.msrb.mxu1 %v393_v19 }
  0x4f   :  { %500 = vmatpush.msrb.mxu2 %v377_v18  ;;  %516 = vmatpush.msrb.mxu3 %v393_v19 }
  0x50   :  { %411 = vmatpush.msrb.mxu0 %v376_v20  ;;  %434 = vmatpush.msrb.mxu1 %v392_v21 }
  0x51   :  { %501 = vmatpush.msrb.mxu2 %v376_v20  ;;  %517 = vmatpush.msrb.mxu3 %v392_v21 }
  0x52   :  { %412 = vmatpush.msrb.mxu0 %v375_v23  ;;  %435 = vmatpush.msrb.mxu1 %v391_v24 }
  0x53   :  { %502 = vmatpush.msrb.mxu2 %v375_v23  ;;  %518 = vmatpush.msrb.mxu3 %v391_v24 }
  0x54   :  { %413 = vmatpush.msrb.mxu0 %v374_v27  ;;  %436 = vmatpush.msrb.mxu1 %v390_v28 }
  0x55   :  { %503 = vmatpush.msrb.mxu2 %v374_v27  ;;  %519 = vmatpush.msrb.mxu3 %v390_v28 }
  0x56   :  { %414 = vmatpush.msrb.mxu0 %v373_v29  ;;  %437 = vmatpush.msrb.mxu1 %v389_v30 }
  0x57   :  { %504 = vmatpush.msrb.mxu2 %v373_v29  ;;  %520 = vmatpush.msrb.mxu3 %v389_v30 }
  0x58   :  { %415 = vmatpush.msrb.mxu0 %v372_v35  ;;  %438 = vmatpush.msrb.mxu1 %v388_v36 }
  0x59   :  { %505 = vmatpush.msrb.mxu2 %v372_v35  ;;  %521 = vmatpush.msrb.mxu3 %v388_v36 }
  0x5a   :  { %416 = vmatpush.msrb.mxu0 %v371_v39  ;;  %439 = vmatpush.msrb.mxu1 %v387_v40 }
  0x5b   :  { %506 = vmatpush.msrb.mxu2 %v371_v39  ;;  %522 = vmatpush.msrb.mxu3 %v387_v40 }
  0x5c   :  { %417 = vmatpush.msrb.mxu0 %v370_v41  ;;  %440 = vmatpush.msrb.mxu1 %v386_v42 }
  0x5d   :  { %507 = vmatpush.msrb.mxu2 %v370_v41  ;;  %523 = vmatpush.msrb.mxu3 %v386_v42 }
  0xb4   :  { %v172_v31 = vpop.f32.mrf.mxu0  ;;  %v195_v32 = vpop.f32.mrf.mxu1 }
  0xb5   :  { %v774_v33 = vadd.f32 %v172_v31, %v151_v25  ;;  %v776_v34 = vadd.f32 %v195_v32, %v152_v26 }
  0xb7   :  { %v488_v37 = vmul.f32 -1.442695, %v774_v33  ;;  %v489_v38 = vmul.f32 -1.442695, %v776_v34 }
  0xb9   :  { %535 = vpow2.f32 %v488_v37 }
  0xba   :  { %537 = vpow2.f32 %v489_v38 }
  0xbc   :  { %v175_v43 = vpop.f32.mrf.mxu0  ;;  %v198_v44 = vpop.f32.mrf.mxu1 }
  0xbd   :  { %v780_v45 = vadd.f32 %v175_v43, %v151_v25  ;;  %v782_v46 = vadd.f32 %v198_v44, %v152_v26 }
  0xbf   :  { %v536_v47 = vpop.eup %535  ;;  %v490_v48 = vmul.f32 -1.442695, %v780_v45  ;;  %v491_v51 = vmul.f32 -1.442695, %v782_v46 }
  0xc0   :  { %v538_v49 = vpop.eup %537  ;;  %v296_v50 = vadd.f32 1.0, %v536_v47  ;;  %v255_v3 = vpop.f32.mrf.mxu2 }
  0xc1   :  { %v297_v52 = vadd.f32 1.0, %v538_v49  ;;  %539 = vpow2.f32 %v490_v48  ;;  %v278_v10 = vpop.f32.mrf.mxu3  ;;  %v256_v17 = vadd.f32 %v255_v3, %v234_v2 }
  0xc2   :  { %541 = vrcp.f32 %v296_v50  ;;  %v309_v63 = vand.u32 2147483647, %v296_v50  ;;  %v311_v0 = vand.u32 2147483648, %v296_v50  ;;  %vm305_vm2 = vweird.f32 %v296_v50 }
  0xc3   :  { %543 = vrcp.f32 %v297_v52  ;;  %v326_v5 = vand.u32 2147483648, %v297_v52  ;;  %v324_v7 = vand.u32 2147483647, %v297_v52  ;;  %vm320_vm5 = vweird.f32 %v297_v52 }
  0xc4   :  { %545 = vpow2.f32 %v491_v51  ;;  %vm310_vm4 = vcmp.eq.f32.partialorder %v309_v63, 8.507059e+37  ;;  %v312_v12 = vor.u32 1.1754944e-38, %v311_v0  ;;  %v279_v20 = vadd.f32 %v278_v10, %v235_v8 }
  0xc5   :  { %v327_v15 = vor.u32 1.1754944e-38, %v326_v5  ;;  %vm325_vm7 = vcmp.eq.f32.partialorder %v324_v7, 8.507059e+37 }
  0xc7   :  { %v540_v53 = vpop.eup %539 }
  0xc8   :  { %v542_v54 = vpop.eup %541  ;;  %v786_v55 = vadd.f32 1.0, %v540_v53  ;;  %v258_v35 = vpop.f32.mrf.mxu2 }
  0xc9   :  { %v544_v56 = vpop.eup %543  ;;  %v301_v57 = vmul.f32 %v542_v54, %v296_v50  ;;  %vm306_vm0 = vweird.f32 %v542_v54  ;;  %v259_v40 = vadd.f32 %v258_v35, %v234_v2  ;;  %v281_v41 = vpop.f32.mrf.mxu3 }
  0xca   :  { %v546_v59 = vpop.eup %545  ;;  %v316_v60 = vmul.f32 %v544_v56, %v297_v52  ;;  %547 = vrcp.f32 %v786_v55  ;;  %vm321_vm1 = vweird.f32 %v544_v56  ;;  %vm307_vm3 = vmor %vm305_vm2, %vm306_vm0  ;;  %v341_v26 = vand.u32 2147483648, %v786_v55 }
  0xcb   :  { %v302_v61 = vsub.f32 1.0, %v301_v57  ;;  %v794_v62 = vadd.f32 1.0, %v546_v59  ;;  %vm322_vm6 = vmor %vm320_vm5, %vm321_vm1  ;;  %v339_v29 = vand.u32 2147483647, %v786_v55  ;;  %vm335_vm9 = vweird.f32 %v786_v55 }
  0xcc   :  { %v317_v1 = vsub.f32 1.0, %v316_v60  ;;  %v282_v49 = vadd.f32 %v281_v41, %v235_v8 }
  0xcd   :  { %v303_v4 = vmul.f32 %v542_v54, %v302_v61  ;;  %549 = vrcp.f32 %v794_v62  ;;  %v354_v38 = vand.u32 2147483647, %v794_v62  ;;  %vm340_vm12 = vcmp.eq.f32.partialorder %v339_v29, 8.507059e+37 }
  0xce   :  { %v318_v6 = vmul.f32 %v544_v56, %v317_v1  ;;  %vm350_vm13 = vweird.f32 %v794_v62 }
  0xcf   :  { %v304_v9 = vadd.f32 %v542_v54, %v303_v4  ;;  %vm355_vm15 = vcmp.eq.f32.partialorder %v354_v38, 8.507059e+37 }
  0xd0   :  { %v548_v11 = vpop.eup %547  ;;  %v319_v13 = vadd.f32 %v544_v56, %v318_v6 }
  0xd1   :  { %v308_v14 = vsel %vm307_vm3, %v542_v54, %v304_v9  ;;  %v331_v16 = vmul.f32 %v548_v11, %v786_v55  ;;  %vm336_vm8 = vweird.f32 %v548_v11  ;;  %v534_v55 = vld [vmem:[%s826_s6] ss:$0 sm:$0xff] }
  0xd2   :  { %v313_v18 = vsel %vm310_vm4, %v312_v12, %v308_v14  ;;  %v323_v19 = vsel %vm322_vm6, %v544_v56, %v319_v13  ;;  %vm337_vm10 = vmor %vm335_vm9, %vm336_vm8 }
  0xd3   :  { %v550_v21 = vpop.eup %549  ;;  %v360_v22 = vmul.f32 %v313_v18, %v774_v33  ;;  %v328_v23 = vsel %vm325_vm7, %v327_v15, %v323_v19  ;;  %v332_v24 = vsub.f32 1.0, %v331_v16  ;;  %v356_v33 = vand.u32 2147483648, %v794_v62 }
  0xd4   :  { %v361_v25 = vmul.f32 %v328_v23, %v776_v34  ;;  %v346_v27 = vmul.f32 %v550_v21, %v794_v62  ;;  %v342_v34 = vor.u32 1.1754944e-38, %v341_v26  ;;  %vm351_vm11 = vweird.f32 %v550_v21 }
  0xd5   :  { %v333_v28 = vmul.f32 %v548_v11, %v332_v24  ;;  %v364_v30 = vmul.f32 %v360_v22, %v256_v17  ;;  %vm352_vm14 = vmor %vm350_vm13, %vm351_vm11  ;;  %v357_v47 = vor.u32 1.1754944e-38, %v356_v33 }
  0xd6   :  { %v347_v31 = vsub.f32 1.0, %v346_v27  ;;  %v365_v32 = vmul.f32 %v361_v25, %v279_v20 }
  0xd7   :  { %v334_v36 = vadd.f32 %v548_v11, %v333_v28  ;;  %418 = vmatmul.f32.vlgmr.msrb.gmra.mxu0 %v364_v30 }
  0xd8   :  { %v348_v37 = vmul.f32 %v550_v21, %v347_v31  ;;  %441 = vmatmul.f32.vlgmr.msrb.gmra.mxu1 %v365_v32 }
  0xd9   :  { %v338_v39 = vsel %vm337_vm10, %v548_v11, %v334_v36 }
  0xda   :  { %v343_v42 = vsel %vm340_vm12, %v342_v34, %v338_v39  ;;  %v349_v43 = vadd.f32 %v550_v21, %v348_v37 }
  0xdb   :  { %v362_v44 = vmul.f32 %v343_v42, %v780_v45 }
  0xdc   :  { %v353_v48 = vsel %vm352_vm14, %v550_v21, %v349_v43 }
  0xdd   :  { %v358_v50 = vsel %vm355_vm15, %v357_v47, %v353_v48  ;;  %v366_v51 = vmul.f32 %v362_v44, %v259_v40 }
  0xde   :  { %v363_v52 = vmul.f32 %v358_v50, %v782_v46 }
  0xdf   :  { %421 = vmatmul.f32.vlgmr.msrb.gmra.mxu2 %v366_v51 }
  0xe0   :  { %v367_v53 = vmul.f32 %v363_v52, %v282_v49 }
  0xe2   :  { %444 = vmatmul.f32.vlgmr.msrb.gmra.mxu3 %v367_v53 }
 0x154   :  { %v419_v54 = vpop.f32.mrf.mxu0 }
 0x155   :  { %v442_v56 = vpop.f32.mrf.mxu1 }
 0x156   :  { %v443_v57 = vadd.f32 %v442_v56, %v419_v54 }
 0x158   :  { %v461_v45 = vadd.f32 %v534_v55, %v443_v57 }
 0x15a   :  { %463 = vst [vmem:[#allocation12] sm:$0xff] %v461_v45 }
 0x162   :  { %v422_v58 = vpop.f32.mrf.mxu2 }
 0x165   :  { %v445_v59 = vpop.f32.mrf.mxu3 }
 0x166   :  { %v446_v46 = vadd.f32 %v445_v59, %v422_v58 }
 0x168   :  { %v462_v60 = vadd.f32 %v534_v55, %v446_v46 }
 0x16a   :  { %464 = vst [vmem:[#allocation12 + $0x8] sm:$0xff] %v462_v60 }
 0x16b   :  { %477 = dma.vmem_to_hbm [thread:$0]  %s470_s29, 256, %s472_s9, [#allocation5], %s708_s19, %s708_s19, %s709_s20  }
 0x16c   :  { %701 = dma.done.wait [#allocation5], 256  }
 0x16d   :  { %702 = vsyncadd [#allocation5], 4294967040 }
 0x16e   :  { %482 = vsyncpa [#allocation4], 1 }
 0x16f   :  { %483 = vsyncpa [#allocation7], 1 }
 0x170   :  { %484 = vsyncpa [#allocation10], 1 }
 0x171   :  { %485 = vsyncpa [#allocation5], 1 }

</bundles_post_ra>
